<compile_context>
chip_gen: v6e
topology: v6e:2x2x1
jax: 0.10.0
libtpu: 0.0.40
codegen_flags: <defaults>
</compile_context>

<pallas_src>
import numpy as np
import jax
import jax.numpy as jnp
from jax.experimental import pallas as pl
from jax.experimental.pallas import tpu as pltpu


_LANES = 128
_SUBLANES = 8
# 2 MiB per block -> in + out, double-buffered = 8 MiB of VMEM: safe on every
# generation's scoped-VMEM default (v5e 16 / v6e 32 / v7x 32 MiB) and close to
# the measured HBM copy roofline.  (Bigger blocks on v6e/v7x buy <~10-20%.)
_TARGET_BLOCK_BYTES = 2 << 20
# Above this payload size, guarantee >= 2 grid steps so v7x's 2 TensorCores
# can both be fed via the "parallel" grid axis.
_MIN_SPLIT_BYTES = 256 << 10


# ---------------------------------------------------------------------------
# Primary path: View.forward — metadata-only, no pallas_call (perf review #1).
# ---------------------------------------------------------------------------
def view_forward(x, target_shape):
    """Pallas-free equivalent of View(target_shape).forward(x).

    A contiguous row-major view is metadata-only in XLA (just like
    torch.Tensor.view), so a pallas_call here would only add dispatch
    overhead and a fusion barrier.
    """
    B = x.shape[0]
    assert int(np.prod(x.shape[1:])) == int(np.prod(target_shape)), (
        f"cannot view {x.shape} as (batch, {target_shape})")
    return x.reshape((B, *target_shape))


# ---------------------------------------------------------------------------
# Secondary path: explicit Pallas materialization (fresh buffer).
# ---------------------------------------------------------------------------
def _copy_kernel(x_ref, o_ref):
    o_ref[...] = x_ref[...]


def view_forward_pallas(x, target_shape):
    """Same semantics as View.forward, but materializes the result into a
    fresh buffer via a lane-dense tiled Pallas copy kernel."""
    B = x.shape[0]
    total = int(np.prod(x.shape[1:]))
    assert total == int(np.prod(target_shape)), (
        f"cannot view {x.shape} as (batch, {target_shape})")

    n = B * total
    if n == 0:                                   # empty payload: nothing to copy
        return x.reshape((B, *target_shape))

    flat = x.reshape(n)                          # metadata-only for contiguous x

    # Widest lane-dense last dim that divides the payload -> wide, unmasked
    # vld/vst and no wrapper-side pad/slice traffic for the common case.
    width = None
    for w in (1024, 512, 256, _LANES):
        if n % w == 0:
            width = w
            break
    if width is None:
        # Ragged payload (not a multiple of 128 elements): pad the tail.
        # TODO(synk): replace with an unpadded ragged-tail grid (or in-kernel
        # masked tail store) to avoid the extra pad/slice HBM traffic.
        width = _LANES
        n_pad = (-n) % (_SUBLANES * _LANES)
        flat = jnp.pad(flat, (0, n_pad))
    else:
        n_pad = 0

    rows = (n + n_pad) // width
    slab = flat.reshape(rows, width)             # metadata-only re-slab
    row_bytes = width * slab.dtype.itemsize
    total_bytes = rows * row_bytes

    if rows <= _SUBLANES:
        # Tiny payload: single full-extent block (always a legal block shape).
        row_tile = rows
    else:
        cap = max(_SUBLANES,
                  (_TARGET_BLOCK_BYTES // row_bytes) // _SUBLANES * _SUBLANES)
        if total_bytes > _MIN_SPLIT_BYTES:
            # Force at least 2 grid steps so both v7x TensorCores get work.
            half = max(_SUBLANES, pl.cdiv(rows, 2) // _SUBLANES * _SUBLANES)
            cap = min(cap, half)
        row_tile = min(cap, rows // _SUBLANES * _SUBLANES)
    grid = (pl.cdiv(rows, row_tile),)            # ragged last block is fine

    out = pl.pallas_call(
        _copy_kernel,
        out_shape=jax.ShapeDtypeStruct((rows, width), x.dtype),
        grid_spec=pltpu.PrefetchScalarGridSpec(
            num_scalar_prefetch=0,
            grid=grid,
            in_specs=[pl.BlockSpec((row_tile, width), lambda i: (i, 0))],
            out_specs=pl.BlockSpec((row_tile, width), lambda i: (i, 0)),
        ),
        compiler_params=pltpu.CompilerParams(
            dimension_semantics=("parallel",)),  # lets v7x's 2 TCs split it
    )(slab)

    flat_out = out.reshape(rows * width)
    if n_pad:
        flat_out = flat_out[:n]
    return flat_out.reshape((B, *target_shape))


if __name__ == "__main__":
    key = jax.random.PRNGKey(0)
    k0, k1, k2 = jax.random.split(key, 3)

    # --- Case 1: NCHW conv-style input viewed as (batch, 8, 128). -----------
    x = jax.random.normal(k0, (2, 4, 16, 16), dtype=jnp.float32)
    shape1 = (8, 128)                            # 4*16*16 = 1024 = 8*128
    ref1 = x.reshape((x.shape[0], *shape1))

    out1 = jax.block_until_ready(view_forward(x, shape1))
    assert out1.shape == (2, 8, 128) and out1.dtype == x.dtype
    np.testing.assert_array_equal(np.asarray(out1), np.asarray(ref1))

    out1p = jax.block_until_ready(view_forward_pallas(x, shape1))
    assert out1p.shape == (2, 8, 128) and out1p.dtype == x.dtype
    np.testing.assert_array_equal(np.asarray(out1p), np.asarray(ref1))

    # --- Case 2: ~1 MiB payload -> multi-block "parallel" grid path. --------
    y = jax.random.normal(k1, (4, 64, 32, 32), dtype=jnp.float32)
    shape2 = (256, 256)                          # 64*32*32 = 65536 = 256*256
    ref2 = y.reshape((y.shape[0], *shape2))
    out2p = jax.block_until_ready(view_forward_pallas(y, shape2))
    assert out2p.shape == (4, 256, 256)
    np.testing.assert_array_equal(np.asarray(out2p), np.asarray(ref2))

    # --- Case 3: ragged payload (not a multiple of 128) -> fallback path. ---
    z = jax.random.normal(k2, (2, 3, 5, 7), dtype=jnp.float32)
    shape3 = (105,)                              # 3*5*7 = 105
    ref3 = z.reshape((z.shape[0], *shape3))
    out3p = jax.block_until_ready(view_forward_pallas(z, shape3))
    assert out3p.shape == (2, 105)
    np.testing.assert_array_equal(np.asarray(out3p), np.asarray(ref3))

    print("KERNEL_OK")
</pallas_src>

<mosaic_0001>
module attributes {stable_mosaic.version = 11 : i64} {
  func.func @_copy_kernel(%arg0: i32, %arg1: memref<2x1024xf32, #tpu.memory_space<vmem>>, %arg2: memref<2x1024xf32, #tpu.memory_space<vmem>>) attributes {dimension_semantics = [#tpu.dimension_semantics<parallel>], iteration_bounds = array<i64: 1>, scalar_prefetch = 0 : i64, scratch_operands = 0 : i64, tpu.core_type = #tpu.core_type<tc>, window_params = [{transform_indices = @transform_0, window_bounds = array<i64: 2, 1024>}, {transform_indices = @transform_1, window_bounds = array<i64: 2, 1024>}]} {
    %c0 = arith.constant 0 : index
    %c0_0 = arith.constant 0 : index
    %0 = vector.load %arg1[%c0, %c0_0] : memref<2x1024xf32, #tpu.memory_space<vmem>>, vector<2x1024xf32>
    %c0_1 = arith.constant 0 : index
    %c0_2 = arith.constant 0 : index
    %1 = vector.load %arg2[%c0_1, %c0_2] : memref<2x1024xf32, #tpu.memory_space<vmem>>, vector<2x1024xf32>
    tpu.vector_store %arg2[%c0_1, %c0_2], %0 {strides = array<i32>} : memref<2x1024xf32, #tpu.memory_space<vmem>>, vector<2x1024xf32>,
    return
  }
  func.func @transform_0(%arg0: i32) -> (i32, i32) {
    %c0_i32 = arith.constant 0 : i32
    %c0_i32_0 = arith.constant 0 : i32
    return %arg0, %c0_i32 : i32, i32
  }
  func.func @transform_1(%arg0: i32) -> (i32, i32) {
    %c0_i32 = arith.constant 0 : i32
    %c0_i32_0 = arith.constant 0 : i32
    return %arg0, %c0_i32 : i32, i32
  }
}

</mosaic_0001>

<bundles_post_ra>
// kernel: tpu_custom_call.1
= control target key start
LH: loop header
LB: loop body
LE: loop exit
PB: predicated region body
PF: predicated region fallthrough
CT: control target
= control target key end

     0   :  { %6 = vsyncpa [#allocation3], 0  ;;  %s104_s0 = inlined_call_operand.hbm [shape: f32[2,1024], index: 0, kind: input, shape index: {}]   ;;  %s105_s1 = inlined_call_operand.hbm [shape: f32[2,1024], index: 1, kind: output, shape index: {}]  }
   0x1   :  { %7 = vsyncpa [#allocation4], 0  ;;  %s86_s6 = smov [#allocation2]  }
   0x2   :  { %s14_s7 = sshll.u32 %s86_s6, 4  ;;  %s15_s7 = int_to_ptr.vmem [resolvable:$true] %s14_s7 }
   0x3   :  { %s50_s8 = scalar_lea.vmem %s15_s7, 256  ;;  %p55_p1 = scmp.lt.s32.totalorder %s15_s7, %s15_s7 }
   0x4   :  { %p51_p0 = scmp.ne.s32.totalorder %s15_s7, %s50_s8  ;;  %p56_p2 = scmp.lt.s32.totalorder %s50_s8, %s50_s8 }
   0x6   :  { %p57_p3 = por %p56_p2, %p55_p1 }
   0x8   :  { %p58_p4 = pnand %p57_p3, %p51_p0 }
   0xa   :  { %61 = shalt.err (!%p58_p4)
}
   0xb   :  { %17 = dma.hbm_to_vmem [thread:$0]  %s104_s0, 256, %s15_s7, [#allocation3]  }
   0xc   :  { %82 = dma.done.wait [#allocation3], 256  }
   0xd   :  { %83 = vsyncadd [#allocation3], 4294967040  ;;  %s87_s11 = smov [#allocation5]   ;;  %v21_v0 = vld [vmem:[#allocation2] sm:$0xff]  ;;  %v22_v1 = vld [vmem:[#allocation2 + $0x8] sm:$0xff] }
   0xe   :  { %s31_s12 = sshll.u32 %s87_s11, 4  ;;  %23 = vst [vmem:[#allocation5] sm:$0xff] %v21_v0  ;;  %24 = vst [vmem:[#allocation5 + $0x8] sm:$0xff] %v22_v1  ;;  %s32_s12 = int_to_ptr.vmem [resolvable:$true] %s31_s12 }
   0xf   :  { %s62_s13 = scalar_lea.vmem %s32_s12, 256  ;;  %p67_p6 = scmp.lt.s32.totalorder %s32_s12, %s32_s12 }
  0x10   :  { %p63_p5 = scmp.ne.s32.totalorder %s32_s12, %s62_s13  ;;  %p68_p7 = scmp.lt.s32.totalorder %s62_s13, %s62_s13 }
  0x12   :  { %p69_p8 = por %p68_p7, %p67_p6 }
  0x14   :  { %p70_p9 = pnand %p69_p8, %p63_p5 }
  0x16   :  { %73 = shalt.err (!%p70_p9)
}
  0x17   :  { %34 = dma.vmem_to_hbm [thread:$0]  %s32_s12, 256, %s105_s1, [#allocation4]  }
  0x18   :  { %84 = dma.done.wait [#allocation4], 256  }
  0x19   :  { %85 = vsyncadd [#allocation4], 4294967040 }
  0x1a   :  { %38 = vsyncpa [#allocation3], 1 }
  0x1b   :  { %39 = vsyncpa [#allocation4], 1 }

</bundles_post_ra>
